<compile_context>
chip_gen: v7x
topology: tpu7x:2x2x1
jax: 0.10.0
libtpu: 0.0.40
codegen_flags: <defaults>
</compile_context>

<pallas_src>
import functools
import math

import jax
import jax.numpy as jnp
from jax.experimental import pallas as pl
from jax.experimental.pallas import tpu as pltpu


def _round_up(x, m):
    return ((x + m - 1) // m) * m


def _sublane(dtype):
    # Sub-32-bit dtypes pack along sublanes: f32 -> 8, bf16 -> 16, int8 -> 32.
    return max(8, 32 // jnp.dtype(dtype).itemsize)


# Large finite negative for masking (avoids -inf - (-inf) -> NaN corner cases).
_NEG_BIG = -1e30


def _flash_sdpa_kernel(q_ref, k_ref, v_ref, o_ref,
                       q_sc, m_sc, l_sc, acc_sc,
                       *, scale, lk_valid, lk_padded, tk):
    kv = pl.program_id(2)
    last_kv = pl.num_programs(2) - 1

    @pl.when(kv == 0)
    def _init():
        # Scale + matmul-dtype cast of Q hoisted out of the kv loop: the Q
        # block is resident across the whole kv sweep, so do this once.
        q = q_ref[...].astype(q_sc.dtype)
        # PyTorch `if scale:` semantics (falsy scale -> no scaling).
        if scale:
            q = q * jnp.asarray(scale, dtype=q.dtype)
        q_sc[...] = q
        m_sc[...] = jnp.full_like(m_sc, -jnp.inf)
        l_sc[...] = jnp.zeros_like(l_sc)
        acc_sc[...] = jnp.zeros_like(acc_sc)

    q = q_sc[...]            # (tq, D)   matmul dtype
    k = k_ref[...]           # (tk, D)   matmul dtype
    v = v_ref[...]           # (tk, Dv)  matmul dtype

    # scores = Q @ K^T, expressed as a contraction over the last dim of both
    # operands (no XLU transpose of the K tile); fp32 accumulation on the MXU.
    s = jax.lax.dot_general(
        q, k,
        dimension_numbers=(((1,), (1,)), ((), ())),
        preferred_element_type=jnp.float32)                      # (tq, tk) f32

    def _online_softmax_update(scores):
        m_prev = m_sc[...]
        m_new = jnp.maximum(m_prev, jnp.max(scores, axis=-1, keepdims=True))
        alpha = jnp.exp(m_prev - m_new)
        p = jnp.exp(scores - m_new)
        l_sc[...] = alpha * l_sc[...] + jnp.sum(p, axis=-1, keepdims=True)
        acc_sc[...] = alpha * acc_sc[...] + jnp.dot(
            p.astype(v.dtype), v, preferred_element_type=jnp.float32)
        m_sc[...] = m_new

    if lk_padded != lk_valid:
        # Only the last kv tile contains zero-padded key columns; mask there
        # only, keeping the iota/compare/select off the hot inner iterations.
        @pl.when(kv == last_kv)
        def _masked():
            col = (lk_padded - tk) + jax.lax.broadcasted_iota(
                jnp.int32, s.shape, 1)
            _online_softmax_update(
                jnp.where(col < lk_valid, s, jnp.float32(_NEG_BIG)))

        @pl.when(kv != last_kv)
        def _unmasked():
            _online_softmax_update(s)
    else:
        _online_softmax_update(s)

    @pl.when(kv == last_kv)
    def _finalize():
        # Exact divide (once per q tile): avoids the approx-reciprocal error
        # in the softmax normalization.
        o_ref[...] = (acc_sc[...] / l_sc[...]).astype(o_ref.dtype)


def scaled_dot_product_attention(Q, K, V, scale=None, *, tq=256, tk=256,
                                 matmul_dtype=jnp.bfloat16, kv_buffering=2):
    """Pallas-TPU equivalent of the PyTorch Scaled_Dot_Product_Attention.forward.

    Q: (B, Lq, D), K: (B, Lk, D), V: (B, Lk, Dv)  ->  (B, Lq, Dv)

    `scale` is a static Python number (falsy -> no scaling, like the module).
    `matmul_dtype`: dtype fed to the MXU (default bf16, fp32 accumulation);
    pass None to keep the input dtype.  `kv_buffering > 2` requests deeper
    pipelining of the K/V stream (useful on v5e).
    """
    B, Lq, D = Q.shape
    Bk, Lk, Dk = K.shape
    Bv, Lkv, Dv = V.shape
    assert (Bk, Dk) == (B, D) and (Bv, Lkv) == (B, Lk)

    out_dtype = Q.dtype
    mm_dtype = jnp.dtype(out_dtype) if matmul_dtype is None else jnp.dtype(matmul_dtype)

    # Sequence tiling: sublane alignment depends on the matmul dtype.
    sub = _sublane(mm_dtype)
    tq_eff = min(_round_up(tq, sub), _round_up(Lq, sub))
    tk_eff = min(_round_up(tk, sub), _round_up(Lk, sub))
    Lq_pad = _round_up(Lq, tq_eff)
    Lk_pad = _round_up(Lk, tk_eff)

    # v7x has 2 TensorCores: keep the parallel grid extent (B * q_tiles) >= 2
    # whenever the problem is big enough to split.
    if B * (Lq_pad // tq_eff) < 2 and Lq > sub:
        tq_eff = _round_up(-(-Lq // 2), sub)
        Lq_pad = _round_up(Lq, tq_eff)

    def _prep(x, l_pad):
        # Cast (if requested) then zero-pad the ragged sequence tail.  The
        # feature dim is never padded: full-dim blocks are legal even when
        # the last dim is < 128.
        if x.dtype != mm_dtype:
            x = x.astype(mm_dtype)
        pad_l = l_pad - x.shape[1]
        if pad_l:
            x = jnp.pad(x, ((0, 0), (0, pad_l), (0, 0)))
        return x

    Qp = _prep(Q, Lq_pad)
    Kp = _prep(K, Lk_pad)
    Vp = _prep(V, Lk_pad)

    grid = (B, Lq_pad // tq_eff, Lk_pad // tk_eff)

    kernel = functools.partial(
        _flash_sdpa_kernel,
        scale=scale, lk_valid=Lk, lk_padded=Lk_pad, tk=tk_eff)

    def _kv_spec(block_shape, index_map):
        # Optional deeper buffering of the K/V stream (v5e: hide DMA latency).
        if kv_buffering and kv_buffering > 2:
            return pl.BlockSpec(block_shape, index_map,
                                pipeline_mode=pl.Buffered(kv_buffering))
        return pl.BlockSpec(block_shape, index_map)

    out = pl.pallas_call(
        kernel,
        out_shape=jax.ShapeDtypeStruct((B, Lq_pad, Dv), out_dtype),
        grid_spec=pltpu.PrefetchScalarGridSpec(
            num_scalar_prefetch=0,
            grid=grid,
            in_specs=[
                # leading batch dim is squeezed (None) -> kernel refs are 2-D
                pl.BlockSpec((None, tq_eff, D), lambda b, qi, ki: (b, qi, 0)),
                _kv_spec((None, tk_eff, D), lambda b, qi, ki: (b, ki, 0)),
                _kv_spec((None, tk_eff, Dv), lambda b, qi, ki: (b, ki, 0)),
            ],
            out_specs=pl.BlockSpec(
                (None, tq_eff, Dv), lambda b, qi, ki: (b, qi, 0)),
            scratch_shapes=[
                pltpu.VMEM((tq_eff, D), mm_dtype),        # scaled/cast Q tile
                pltpu.VMEM((tq_eff, 1), jnp.float32),     # running max
                pltpu.VMEM((tq_eff, 1), jnp.float32),     # running denom
                pltpu.VMEM((tq_eff, Dv), jnp.float32),    # fp32 accumulator
            ],
        ),
        compiler_params=pltpu.CompilerParams(
            dimension_semantics=("parallel", "parallel", "arbitrary"),
        ),
    )(Qp, Kp, Vp)

    # Strip the ragged sequence tail (no feature padding to strip).
    if Lq_pad != Lq:
        out = out[:, :Lq, :]
    return out


def _reference(Q, K, V, scale=None):
    s = jnp.einsum("bld,bmd->blm",
                   Q.astype(jnp.float32), K.astype(jnp.float32),
                   precision=jax.lax.Precision.HIGHEST)
    if scale:
        s = s * scale
    p = jax.nn.softmax(s, axis=-1)
    out = jnp.einsum("blm,bmd->bld", p, V.astype(jnp.float32),
                     precision=jax.lax.Precision.HIGHEST)
    return out.astype(Q.dtype)


if __name__ == "__main__":
    # Small, deterministic shapes consistent with the module:
    # batch=2, seq=8, hidden=32.
    B, L, D = 2, 8, 32
    key = jax.random.PRNGKey(0)
    kq, kk, kv = jax.random.split(key, 3)
    Q = jax.random.normal(kq, (B, L, D), dtype=jnp.float32)
    K = jax.random.normal(kk, (B, L, D), dtype=jnp.float32)
    V = jax.random.normal(kv, (B, L, D), dtype=jnp.float32)
    scale = 1.0 / math.sqrt(D)

    # Default (bf16 matmul, fp32 accumulation) path.
    out = jax.block_until_ready(scaled_dot_product_attention(Q, K, V, scale=scale))
    ref = _reference(Q, K, V, scale=scale)
    assert out.shape == (B, L, D)
    assert jnp.allclose(out, ref, atol=5e-2, rtol=5e-2), "mismatch (bf16 path)"

    # Full-precision path (matmul_dtype=None keeps the input dtype).
    out_fp = jax.block_until_ready(
        scaled_dot_product_attention(Q, K, V, scale=scale, matmul_dtype=None))
    assert jnp.allclose(out_fp, ref, atol=5e-2, rtol=5e-2), "mismatch (fp32 path)"

    # PyTorch `if scale:` falsy branch (scale=None -> no scaling); use small-
    # magnitude inputs so the unscaled softmax stays well conditioned.
    Qs, Ks, Vs = Q * 0.2, K * 0.2, V
    out_ns = jax.block_until_ready(scaled_dot_product_attention(Qs, Ks, Vs, scale=None))
    ref_ns = _reference(Qs, Ks, Vs, scale=None)
    assert jnp.allclose(out_ns, ref_ns, atol=5e-2, rtol=5e-2), "mismatch (no scale)"

    # Tiled + masked path: ragged sequence length -> several kv tiles, padded
    # key columns masked only on the last tile, padded query rows sliced off.
    B2, L2 = 2, 300
    kq2, kk2, kv2 = jax.random.split(jax.random.PRNGKey(1), 3)
    Q2 = jax.random.normal(kq2, (B2, L2, D), dtype=jnp.float32)
    K2 = jax.random.normal(kk2, (B2, L2, D), dtype=jnp.float32)
    V2 = jax.random.normal(kv2, (B2, L2, D), dtype=jnp.float32)
    out2 = jax.block_until_ready(
        scaled_dot_product_attention(Q2, K2, V2, scale=1.0 / math.sqrt(D),
                                     tq=128, tk=128))
    ref2 = _reference(Q2, K2, V2, scale=1.0 / math.sqrt(D))
    assert out2.shape == (B2, L2, D)
    assert jnp.allclose(out2, ref2, atol=5e-2, rtol=5e-2), "mismatch (tiled path)"

    print("KERNEL_OK")
</pallas_src>

<mosaic_0001>
module attributes {stable_mosaic.version = 11 : i64} {
  func.func @_flash_sdpa_kernel(%arg0: i32, %arg1: i32, %arg2: i32, %arg3: memref<1x16x32xbf16, #tpu.memory_space<vmem>>, %arg4: memref<1x16x32xbf16, #tpu.memory_space<vmem>>, %arg5: memref<1x16x32xbf16, #tpu.memory_space<vmem>>, %arg6: memref<1x16x32xf32, #tpu.memory_space<vmem>>, %arg7: memref<16x32xbf16, #tpu.memory_space<vmem>>, %arg8: memref<16x1xf32, #tpu.memory_space<vmem>>, %arg9: memref<16x1xf32, #tpu.memory_space<vmem>>, %arg10: memref<16x32xf32, #tpu.memory_space<vmem>>) attributes {dimension_semantics = [#tpu.dimension_semantics<parallel>, #tpu.dimension_semantics<parallel>, #tpu.dimension_semantics<arbitrary>], iteration_bounds = array<i64: 2, 1, 1>, scalar_prefetch = 0 : i64, scratch_operands = 4 : i64, tpu.core_type = #tpu.core_type<tc>, window_params = [{transform_indices = @transform_0, window_bounds = array<i64: 1, 16, 32>}, {transform_indices = @transform_1, window_bounds = array<i64: 1, 16, 32>}, {transform_indices = @transform_2, window_bounds = array<i64: 1, 16, 32>}, {transform_indices = @transform_3, window_bounds = array<i64: 1, 16, 32>}]} {
    %c0_i32 = arith.constant 0 : i32
    %0 = arith.cmpi eq, %arg2, %c0_i32 : i32
    %1 = arith.extui %0 : i1 to i32
    %c0_i32_0 = arith.constant 0 : i32
    %2 = arith.cmpi ne, %1, %c0_i32_0 : i32
    scf.if %2 {
      %c0_14 = arith.constant 0 : index
      %c0_15 = arith.constant 0 : index
      %c0_16 = arith.constant 0 : index
      %18 = vector.load %arg3[%c0_14, %c0_15, %c0_16] : memref<1x16x32xbf16, #tpu.memory_space<vmem>>, vector<1x16x32xbf16>
      %19 = vector.shape_cast %18 : vector<1x16x32xbf16> to vector<16x32xbf16>
      %cst_17 = arith.constant 1.767580e-01 : bf16
      %20 = vector.broadcast %cst_17 : bf16 to vector<16x32xbf16>
      %21 = arith.mulf %19, %20 : vector<16x32xbf16>
      %c0_18 = arith.constant 0 : index
      %c0_19 = arith.constant 0 : index
      %22 = vector.load %arg7[%c0_18, %c0_19] : memref<16x32xbf16, #tpu.memory_space<vmem>>, vector<16x32xbf16>
      tpu.vector_store %arg7[%c0_18, %c0_19], %21 {strides = array<i32>} : memref<16x32xbf16, #tpu.memory_space<vmem>>, vector<16x32xbf16>,
      %cst_20 = arith.constant 0xFF800000 : f32
      %23 = vector.broadcast %cst_20 : f32 to vector<16x1xf32>
      %c0_21 = arith.constant 0 : index
      %c0_22 = arith.constant 0 : index
      %24 = vector.load %arg8[%c0_21, %c0_22] : memref<16x1xf32, #tpu.memory_space<vmem>>, vector<16x1xf32>
      tpu.vector_store %arg8[%c0_21, %c0_22], %23 {strides = array<i32>} : memref<16x1xf32, #tpu.memory_space<vmem>>, vector<16x1xf32>,
      %cst_23 = arith.constant 0.000000e+00 : f32
      %25 = vector.broadcast %cst_23 : f32 to vector<16x1xf32>
      %c0_24 = arith.constant 0 : index
      %c0_25 = arith.constant 0 : index
      %26 = vector.load %arg9[%c0_24, %c0_25] : memref<16x1xf32, #tpu.memory_space<vmem>>, vector<16x1xf32>
      tpu.vector_store %arg9[%c0_24, %c0_25], %25 {strides = array<i32>} : memref<16x1xf32, #tpu.memory_space<vmem>>, vector<16x1xf32>,
      %cst_26 = arith.constant 0.000000e+00 : f32
      %27 = vector.broadcast %cst_26 : f32 to vector<16x32xf32>
      %c0_27 = arith.constant 0 : index
      %c0_28 = arith.constant 0 : index
      %28 = vector.load %arg10[%c0_27, %c0_28] : memref<16x32xf32, #tpu.memory_space<vmem>>, vector<16x32xf32>
      tpu.vector_store %arg10[%c0_27, %c0_28], %27 {strides = array<i32>} : memref<16x32xf32, #tpu.memory_space<vmem>>, vector<16x32xf32>,
    } else {
    }
    %c0 = arith.constant 0 : index
    %c0_1 = arith.constant 0 : index
    %3 = vector.load %arg7[%c0, %c0_1] : memref<16x32xbf16, #tpu.memory_space<vmem>>, vector<16x32xbf16>
    %c0_2 = arith.constant 0 : index
    %c0_3 = arith.constant 0 : index
    %c0_4 = arith.constant 0 : index
    %4 = vector.load %arg4[%c0_2, %c0_3, %c0_4] : memref<1x16x32xbf16, #tpu.memory_space<vmem>>, vector<1x16x32xbf16>
    %5 = vector.shape_cast %4 : vector<1x16x32xbf16> to vector<16x32xbf16>
    %c0_5 = arith.constant 0 : index
    %c0_6 = arith.constant 0 : index
    %c0_7 = arith.constant 0 : index
    %6 = vector.load %arg5[%c0_5, %c0_6, %c0_7] : memref<1x16x32xbf16, #tpu.memory_space<vmem>>, vector<1x16x32xbf16>
    %7 = vector.shape_cast %6 : vector<1x16x32xbf16> to vector<16x32xbf16>
    %cst = arith.constant dense<0.000000e+00> : vector<16x16xf32>
    %8 = tpu.matmul %3, %5, %cst {dimension_numbers = #tpu.dot_dimension_numbers<[1], [1], [0], [0], [0, 0, 1, 0], [], []>} : vector<16x32xbf16>, vector<16x32xbf16>, vector<16x16xf32> -> vector<16x16xf32>
    %c0_i32_8 = arith.constant 0 : i32
    %9 = arith.cmpi eq, %arg2, %c0_i32_8 : i32
    %10 = arith.extui %9 : i1 to i32
    %c0_i32_9 = arith.constant 0 : i32
    %11 = arith.cmpi ne, %10, %c0_i32_9 : i32
    scf.if %11 {
      %18 = tpu.iota {dimensions = array<i32: 1>} : vector<16x16xi32>
      %c0_i32_14 = arith.constant 0 : i32
      %19 = vector.broadcast %c0_i32_14 : i32 to vector<16x16xi32>
      %20 = arith.addi %19, %18 : vector<16x16xi32>
      %c8_i32 = arith.constant 8 : i32
      %21 = vector.broadcast %c8_i32 : i32 to vector<16x16xi32>
      %22 = arith.cmpi slt, %20, %21 : vector<16x16xi32>
      %cst_15 = arith.constant -1.000000e+30 : f32
      %23 = vector.broadcast %cst_15 : f32 to vector<16x16xf32>
      %24 = arith.select %22, %8, %23 : vector<16x16xi1>, vector<16x16xf32>
      %c0_16 = arith.constant 0 : index
      %c0_17 = arith.constant 0 : index
      %25 = vector.load %arg8[%c0_16, %c0_17] : memref<16x1xf32, #tpu.memory_space<vmem>>, vector<16x1xf32>
      %cst_18 = arith.constant dense<0xFF800000> : vector<16xf32>
      %26 = vector.multi_reduction <maximumf>, %24, %cst_18 [1] : vector<16x16xf32> to vector<16xf32>
      %27 = vector.shape_cast %26 : vector<16xf32> to vector<16x1xf32>
      %28 = arith.maximumf %25, %27 : vector<16x1xf32>
      %29 = arith.subf %25, %28 : vector<16x1xf32>
      %30 = math.exp %29 : vector<16x1xf32>
      %31 = vector.broadcast %28 : vector<16x1xf32> to vector<16x16xf32>
      %32 = arith.subf %24, %31 : vector<16x16xf32>
      %33 = math.exp %32 : vector<16x16xf32>
      %c0_19 = arith.constant 0 : index
      %c0_20 = arith.constant 0 : index
      %34 = vector.load %arg9[%c0_19, %c0_20] : memref<16x1xf32, #tpu.memory_space<vmem>>, vector<16x1xf32>
      %35 = arith.mulf %30, %34 : vector<16x1xf32>
      %cst_21 = arith.constant dense<0.000000e+00> : vector<16xf32>
      %36 = vector.multi_reduction <add>, %33, %cst_21 [1] : vector<16x16xf32> to vector<16xf32>
      %37 = vector.shape_cast %36 : vector<16xf32> to vector<16x1xf32>
      %38 = arith.addf %35, %37 : vector<16x1xf32>
      %c0_22 = arith.constant 0 : index
      %c0_23 = arith.constant 0 : index
      %39 = vector.load %arg9[%c0_22, %c0_23] : memref<16x1xf32, #tpu.memory_space<vmem>>, vector<16x1xf32>
      tpu.vector_store %arg9[%c0_22, %c0_23], %38 {strides = array<i32>} : memref<16x1xf32, #tpu.memory_space<vmem>>, vector<16x1xf32>,
      %c0_24 = arith.constant 0 : index
      %c0_25 = arith.constant 0 : index
      %40 = vector.load %arg10[%c0_24, %c0_25] : memref<16x32xf32, #tpu.memory_space<vmem>>, vector<16x32xf32>
      %41 = vector.broadcast %30 : vector<16x1xf32> to vector<16x32xf32>
      %42 = arith.mulf %41, %40 : vector<16x32xf32>
      %43 = arith.truncf %33 : vector<16x16xf32> to vector<16x16xbf16>
      %cst_26 = arith.constant dense<0.000000e+00> : vector<16x32xf32>
      %44 = tpu.matmul %43, %7, %cst_26 {dimension_numbers = #tpu.dot_dimension_numbers<[1], [0], [0], [1], [0, 0, 1, 1], [], []>} : vector<16x16xbf16>, vector<16x32xbf16>, vector<16x32xf32> -> vector<16x32xf32>
      %45 = arith.addf %42, %44 : vector<16x32xf32>
      %c0_27 = arith.constant 0 : index
      %c0_28 = arith.constant 0 : index
      %46 = vector.load %arg10[%c0_27, %c0_28] : memref<16x32xf32, #tpu.memory_space<vmem>>, vector<16x32xf32>
      tpu.vector_store %arg10[%c0_27, %c0_28], %45 {strides = array<i32>} : memref<16x32xf32, #tpu.memory_space<vmem>>, vector<16x32xf32>,
      %c0_29 = arith.constant 0 : index
      %c0_30 = arith.constant 0 : index
      %47 = vector.load %arg8[%c0_29, %c0_30] : memref<16x1xf32, #tpu.memory_space<vmem>>, vector<16x1xf32>
      tpu.vector_store %arg8[%c0_29, %c0_30], %28 {strides = array<i32>} : memref<16x1xf32, #tpu.memory_space<vmem>>, vector<16x1xf32>,
    } else {
    }
    %c0_i32_10 = arith.constant 0 : i32
    %12 = arith.cmpi ne, %arg2, %c0_i32_10 : i32
    %13 = arith.extui %12 : i1 to i32
    %c0_i32_11 = arith.constant 0 : i32
    %14 = arith.cmpi ne, %13, %c0_i32_11 : i32
    scf.if %14 {
      %c0_14 = arith.constant 0 : index
      %c0_15 = arith.constant 0 : index
      %18 = vector.load %arg8[%c0_14, %c0_15] : memref<16x1xf32, #tpu.memory_space<vmem>>, vector<16x1xf32>
      %cst_16 = arith.constant dense<0xFF800000> : vector<16xf32>
      %19 = vector.multi_reduction <maximumf>, %8, %cst_16 [1] : vector<16x16xf32> to vector<16xf32>
      %20 = vector.shape_cast %19 : vector<16xf32> to vector<16x1xf32>
      %21 = arith.maximumf %18, %20 : vector<16x1xf32>
      %22 = arith.subf %18, %21 : vector<16x1xf32>
      %23 = math.exp %22 : vector<16x1xf32>
      %24 = vector.broadcast %21 : vector<16x1xf32> to vector<16x16xf32>
      %25 = arith.subf %8, %24 : vector<16x16xf32>
      %26 = math.exp %25 : vector<16x16xf32>
      %c0_17 = arith.constant 0 : index
      %c0_18 = arith.constant 0 : index
      %27 = vector.load %arg9[%c0_17, %c0_18] : memref<16x1xf32, #tpu.memory_space<vmem>>, vector<16x1xf32>
      %28 = arith.mulf %23, %27 : vector<16x1xf32>
      %cst_19 = arith.constant dense<0.000000e+00> : vector<16xf32>
      %29 = vector.multi_reduction <add>, %26, %cst_19 [1] : vector<16x16xf32> to vector<16xf32>
      %30 = vector.shape_cast %29 : vector<16xf32> to vector<16x1xf32>
      %31 = arith.addf %28, %30 : vector<16x1xf32>
      %c0_20 = arith.constant 0 : index
      %c0_21 = arith.constant 0 : index
      %32 = vector.load %arg9[%c0_20, %c0_21] : memref<16x1xf32, #tpu.memory_space<vmem>>, vector<16x1xf32>
      tpu.vector_store %arg9[%c0_20, %c0_21], %31 {strides = array<i32>} : memref<16x1xf32, #tpu.memory_space<vmem>>, vector<16x1xf32>,
      %c0_22 = arith.constant 0 : index
      %c0_23 = arith.constant 0 : index
      %33 = vector.load %arg10[%c0_22, %c0_23] : memref<16x32xf32, #tpu.memory_space<vmem>>, vector<16x32xf32>
      %34 = vector.broadcast %23 : vector<16x1xf32> to vector<16x32xf32>
      %35 = arith.mulf %34, %33 : vector<16x32xf32>
      %36 = arith.truncf %26 : vector<16x16xf32> to vector<16x16xbf16>
      %cst_24 = arith.constant dense<0.000000e+00> : vector<16x32xf32>
      %37 = tpu.matmul %36, %7, %cst_24 {dimension_numbers = #tpu.dot_dimension_numbers<[1], [0], [0], [1], [0, 0, 1, 1], [], []>} : vector<16x16xbf16>, vector<16x32xbf16>, vector<16x32xf32> -> vector<16x32xf32>
      %38 = arith.addf %35, %37 : vector<16x32xf32>
      %c0_25 = arith.constant 0 : index
      %c0_26 = arith.constant 0 : index
      %39 = vector.load %arg10[%c0_25, %c0_26] : memref<16x32xf32, #tpu.memory_space<vmem>>, vector<16x32xf32>
      tpu.vector_store %arg10[%c0_25, %c0_26], %38 {strides = array<i32>} : memref<16x32xf32, #tpu.memory_space<vmem>>, vector<16x32xf32>,
      %c0_27 = arith.constant 0 : index
      %c0_28 = arith.constant 0 : index
      %40 = vector.load %arg8[%c0_27, %c0_28] : memref<16x1xf32, #tpu.memory_space<vmem>>, vector<16x1xf32>
      tpu.vector_store %arg8[%c0_27, %c0_28], %21 {strides = array<i32>} : memref<16x1xf32, #tpu.memory_space<vmem>>, vector<16x1xf32>,
    } else {
    }
    %c0_i32_12 = arith.constant 0 : i32
    %15 = arith.cmpi eq, %arg2, %c0_i32_12 : i32
    %16 = arith.extui %15 : i1 to i32
    %c0_i32_13 = arith.constant 0 : i32
    %17 = arith.cmpi ne, %16, %c0_i32_13 : i32
    scf.if %17 {
      %c0_14 = arith.constant 0 : index
      %c0_15 = arith.constant 0 : index
      %18 = vector.load %arg10[%c0_14, %c0_15] : memref<16x32xf32, #tpu.memory_space<vmem>>, vector<16x32xf32>
      %c0_16 = arith.constant 0 : index
      %c0_17 = arith.constant 0 : index
      %19 = vector.load %arg9[%c0_16, %c0_17] : memref<16x1xf32, #tpu.memory_space<vmem>>, vector<16x1xf32>
      %20 = vector.broadcast %19 : vector<16x1xf32> to vector<16x32xf32>
      %21 = arith.divf %18, %20 : vector<16x32xf32>
      %c0_18 = arith.constant 0 : index
      %c0_19 = arith.constant 0 : index
      %c0_20 = arith.constant 0 : index
      %22 = vector.load %arg6[%c0_18, %c0_19, %c0_20] : memref<1x16x32xf32, #tpu.memory_space<vmem>>, vector<1x16x32xf32>
      %23 = vector.shape_cast %22 : vector<1x16x32xf32> to vector<16x32xf32>
      %24 = vector.shape_cast %21 : vector<16x32xf32> to vector<1x16x32xf32>
      tpu.vector_store %arg6[%c0_18, %c0_19, %c0_20], %24 {strides = array<i32>} : memref<1x16x32xf32, #tpu.memory_space<vmem>>, vector<1x16x32xf32>,
    } else {
    }
    return
  }
  func.func @transform_0(%arg0: i32, %arg1: i32, %arg2: i32) -> (i32, i32, i32) {
    %c0_i32 = arith.constant 0 : i32
    %c0_i32_0 = arith.constant 0 : i32
    return %arg0, %arg1, %c0_i32 : i32, i32, i32
  }
  func.func @transform_1(%arg0: i32, %arg1: i32, %arg2: i32) -> (i32, i32, i32) {
    %c0_i32 = arith.constant 0 : i32
    %c0_i32_0 = arith.constant 0 : i32
    return %arg0, %arg2, %c0_i32 : i32, i32, i32
  }
  func.func @transform_2(%arg0: i32, %arg1: i32, %arg2: i32) -> (i32, i32, i32) {
    %c0_i32 = arith.constant 0 : i32
    %c0_i32_0 = arith.constant 0 : i32
    return %arg0, %arg2, %c0_i32 : i32, i32, i32
  }
  func.func @transform_3(%arg0: i32, %arg1: i32, %arg2: i32) -> (i32, i32, i32) {
    %c0_i32 = arith.constant 0 : i32
    %c0_i32_0 = arith.constant 0 : i32
    return %arg0, %arg1, %c0_i32 : i32, i32, i32
  }
}

</mosaic_0001>

<bundles_post_ra>
// kernel: tpu_custom_call.1
= control target key start
LH: loop header
LB: loop body
LE: loop exit
PB: predicated region body
PF: predicated region fallthrough
CT: control target
= control target key end

     0   :  { %s1476_s0 = inlined_call_operand.hbm [shape: bf16[2,16,32], index: 0, kind: input, shape index: {}]   ;;  %s1477_s1 = inlined_call_operand.hbm [shape: bf16[2,16,32], index: 1, kind: input, shape index: {}]   ;;  %s1478_s2 = inlined_call_operand.hbm [shape: bf16[2,16,32], index: 2, kind: input, shape index: {}]   ;;  %s1479_s3 = inlined_call_operand.hbm [shape: f32[2,16,32], index: 3, kind: output, shape index: {}]  }
   0x1   :  { %1489 = sst [smem:[#allocation19_spill]] %s1477_s1 }
   0x2   :  { %8 = vsyncpa [#allocation7], 0 }
   0x3   :  { %10 = vsyncpa [#allocation7 + $0x1], 0 }
   0x4   :  { %11 = vsyncpa [#allocation10], 0 }
   0x5   :  { %13 = vsyncpa [#allocation10 + $0x1], 0 }
   0x6   :  { %14 = vsyncpa [#allocation8], 0 }
   0x7   :  { %16 = vsyncpa [#allocation8 + $0x1], 0  ;;  %s1170_s12 = smov 0   ;;  %s1172_s13 = smov 0  }
   0x8   :  { %s1174_s14 = smov 0   ;;  %s1176_s15 = smov 0  }
   0x9   :  { %s1178_s16 = smov 0   ;;  %s1180_s17 = smov 0  }
   0xa LB: > { %1490 = sst [smem:[#allocation16_spill]] %s1132_s16  ;;  %s1201_s18 = sadd.s32 4294967295, %s1136_s17   ;;  %s1136_s17 = sphi %s1180_s17, %s22_s17   ;;  %s1132_s16 = sphi %s1178_s16, %s1517_s16   ;;  %s1128_s15 = sphi %s1176_s15, %s1512_s15   ;;  %s1124_s14 = sphi %s1174_s14, %s1516_s14   ;;  %s1120_s13 = sphi %s1172_s13, %s1515_s13   ;;  %s1116_s12 = sphi %s1170_s12, %s1514_s12  }
   0xb   : > { %s815_s19 = sadd.s32 4294967294, %s1136_s17   ;;  %s41_s20 = sadd.s32 1, %s1132_s16 }
   0xc   : > { %s50_s21 = sadd.s32 1, %s1124_s14  ;;  %p43_p0 = scmp.ge.s32.totalorder %s41_s20, 2 }
   0xd   : > { %p57_p1 = scmp.ne.s32.totalorder %s1124_s14, %s1120_s13  ;;  %p58_p2 = scmp.eq.s32.totalorder %s1136_s17, 0 }
   0xe   : > { %p63_p3 = scmp.ne.s32.totalorder %s1120_s13, %s1116_s12  ;;  %s1519_s20 = smov (%p43_p0, %s41_s20), 0 }
   0xf   : > { %1491 = sst [smem:[#allocation17_spill]] %s1519_s20  ;;  %p1213_p4 = por %p58_p2, %p57_p1 }
  0x10   : > { %p64_p5 = scmp.eq.s32.totalorder %s1201_s18, 0  ;;  %s45_s23 = ssub.s32 %s1132_s16, %s1519_s20 }
  0x11   : > { %p145_p6 = scmp.eq.s32.totalorder %s1201_s18, 1  ;;  %p48_p7 = scmp.eq.s32.totalorder %s45_s23, 0 }
  0x12   : > { %p1221_p8 = por %p64_p5, %p63_p3  ;;  %p151_p10 = scmp.eq.s32.totalorder %s815_s19, 1 }
  0x13   : > { %p1225_p9 = por %p145_p6, %p57_p1  ;;  %p886_p13 = scmp.lt.s32.totalorder %s1136_s17, 2 }
  0x14   : > { %s1493_s24 = scalar_select %p1221_p8, 1, 0 }
  0x15   : > { %s1494_s25 = scalar_select %p1225_p9, 1, 0 }
  0x16   : > { %s1230_s26 = scalar_select %p48_p7, %s1124_s14, %s50_s21  }
  0x17   : > { %p1232_p11 = por %p151_p10, %p63_p3  ;;  %s1482_s28 = sand.u32 1, %s1124_s14  }
  0x18   : > { %1495 = sst [smem:[#allocation18_spill]] %s1230_s26  ;;  %s1241_s29 = sshll.u32 %s1482_s28, 3 }
  0x19   : > { %s1496_s27 = scalar_select %p1232_p11, 1, 0 }
  0x1a   : > { %s1244_s30 = sshll.u32 %s1132_s16, 7  ;;  %p1248_p0 = pnand %p886_p13, %p1213_p4 }
  0x1b   : > { %s194_s5 = sand.u32 1, %s1136_s17   ;;  %s1498_s1 = sld [smem:[#allocation19_spill]] }
  0x1c   : > { %s198_s9 = scalar_lea.vmem [#allocation9], %s1241_s29  ;;  %s1264_s11 = scalar_lea.sflag [#allocation10], %s194_s5 }
  0x1d   : > { %s207_s10 = sshll.u32 %s198_s9, 4  ;;  %p1270_p4 = pneg %p1248_p0  ;;  %s1261_s10 = int_to_ptr.vmem [resolvable:$true] %s207_s10 }
  0x21   : > { %s1257_s8 = scalar_lea.hbm %s1498_s1, %s1244_s30  ;;  %s965_s6 = scalar_lea.hbm %s1498_s1, 256 }
  0x22   : > { %s960_s19 = scalar_lea.hbm %s1257_s8, 128  ;;  %p966_p7 = scmp.lt.u32.totalorder %s1257_s8, %s1498_s1 }
  0x23   : > { %p961_p3 = scmp.ne.s32.totalorder %s1257_s8, %s960_s19  ;;  %p967_p10 = scmp.lt.u32.totalorder %s965_s6, %s960_s19 }
  0x24   : > { %p969_p12 = scmp.lt.u32.totalorder %s960_s19, %s1257_s8 }
  0x25   : > { %p963_p5 = pnand %p1270_p4, %p961_p3  ;;  %p968_p13 = por %p967_p10, %p966_p7 }
  0x27   : > { %p964_p6 = pneg %p963_p5  ;;  %p970_p1 = por %p969_p12, %p968_p13 }
  0x29   : > { %p971_p2 = pnand %p970_p1, %p964_p6 }
  0x2b   : > { %974 = shalt.err (!%p971_p2)
}
  0x2c   : > { %s975_s5 = scalar_lea.vmem %s1261_s10, 128  ;;  %s1138_s22 = smov [#allocation9]  }
  0x2d   : > { %p976_p3 = scmp.ne.s32.totalorder %s1261_s10, %s975_s5  ;;  %s980_s23 = sshll.u32 %s1138_s22, 4  ;;  %s981_s23 = int_to_ptr.vmem [resolvable:$false] %s980_s23 }
  0x2e   : > { %s982_s7 = scalar_lea.vmem %s981_s23, 256  ;;  %p983_p9 = scmp.lt.s32.totalorder %s1261_s10, %s981_s23 }
  0x2f   : > { %p978_p5 = pnand %p976_p3, %p1270_p4  ;;  %p984_p8 = scmp.lt.s32.totalorder %s982_s7, %s975_s5 }
  0x31   : > { %p979_p11 = pneg %p978_p5  ;;  %p985_p7 = por %p984_p8, %p983_p9 }
  0x33   : > { %p986_p10 = pnand %p985_p7, %p979_p11 }
  0x35   : > { %989 = shalt.err (!%p986_p10)
}
  0x36   : > { %s1483_s19 = smov 64   ;;  %s1485_s6 = smov 4  }
  0x37   : > { %878 = dma.hbm_to_vmem [thread:$0]  (!%p1248_p0), %s1257_s8, 128, %s1261_s10, %s1264_s11, %s1483_s19, %s1483_s19, %s1485_s6  }
  0x38   : > { %p1500_p8 = scmp.lt.s32.totalorder %s1136_s17, 3  ;;  %p1501_p9 = scmp.ge.s32.totalorder %s1136_s17, 1 }
  0x39   : > { %s1309_s23 = scalar_lea.hbm %s1476_s0, %s1244_s30  ;;  %s175_s7 = scalar_lea.vmem [#allocation6], %s1241_s29 }
  0x3a   : > { %p1301_p11 = pnand %p1501_p9, %p1500_p8  ;;  %s184_s28 = sshll.u32 %s175_s7, 4  ;;  %s1312_s28 = int_to_ptr.vmem [resolvable:$true] %s184_s28 }
  0x3b   : > { %s1318_s19 = scalar_lea.hbm %s1478_s2, %s1244_s30  ;;  %s1503_s6 = sand.u32 1, %s1124_s14  }
  0x3c   : > { %s1502_s9 = scalar_select %p1301_p11, 1, 0 }
  0x3d   : > { %s1322_s1 = scalar_lea.sflag [#allocation7], %s1503_s6  ;;  %s990_s20 = scalar_lea.hbm %s1309_s23, 128 }
  0x3e   : > { %p991_p12 = scmp.ne.s32.totalorder %s1309_s23, %s990_s20  ;;  %s995_s16 = scalar_lea.hbm %s1476_s0, 256 }
  0x3f   : > { %p996_p6 = scmp.lt.u32.totalorder %s1309_s23, %s1476_s0  ;;  %p997_p13 = scmp.lt.u32.totalorder %s995_s16, %s990_s20 }
  0x40   : > { %p993_p1 = pnand %p991_p12, %p1270_p4  ;;  %p999_p5 = scmp.lt.u32.totalorder %s990_s20, %s1309_s23 }
  0x41   : > { %p998_p3 = por %p997_p13, %p996_p6 }
  0x42   : > { %p994_p2 = pneg %p993_p1 }
  0x43   : > { %p1000_p7 = por %p999_p5, %p998_p3 }
  0x45   : > { %p1001_p10 = pnand %p1000_p7, %p994_p2 }
  0x47   : > { %1004 = shalt.err (!%p1001_p10)
}
  0x48   : > { %s1005_s30 = scalar_lea.vmem %s1312_s28, 128  ;;  %s1141_s6 = smov [#allocation6]  }
  0x49   : > { %p1006_p8 = scmp.ne.s32.totalorder %s1312_s28, %s1005_s30  ;;  %s1010_s8 = sshll.u32 %s1141_s6, 4  ;;  %s1011_s8 = int_to_ptr.vmem [resolvable:$false] %s1010_s8 }
  0x4a   : > { %s1012_s26 = scalar_lea.vmem %s1011_s8, 256  ;;  %p1013_p1 = scmp.lt.s32.totalorder %s1312_s28, %s1011_s8 }
  0x4b   : > { %p1008_p9 = pnand %p1006_p8, %p1270_p4  ;;  %p1014_p11 = scmp.lt.s32.totalorder %s1012_s26, %s1005_s30 }
  0x4d   : > { %p1009_p12 = pneg %p1008_p9  ;;  %p1015_p6 = por %p1014_p11, %p1013_p1 }
  0x4f   : > { %p1016_p13 = pnand %p1015_p6, %p1009_p12 }
  0x51   : > { %1019 = shalt.err (!%p1016_p13)
}
  0x52   : > { %s1504_s16 = smov 4   ;;  %s1505_s20 = smov 64  }
  0x53   : > { %875 = dma.hbm_to_vmem [thread:$0]  (!%p1248_p0), %s1309_s23, 128, %s1312_s28, %s1322_s1, %s1505_s20, %s1505_s20, %s1504_s16  }
  0x54   : > { %s221_s10 = scalar_lea.vmem [#allocation11], %s1241_s29  ;;  %s1020_s22 = scalar_lea.hbm %s1318_s19, 128 }
  0x55   : > { %s230_s5 = sshll.u32 %s221_s10, 4  ;;  %p1021_p11 = scmp.ne.s32.totalorder %s1318_s19, %s1020_s22  ;;  %s1350_s5 = int_to_ptr.vmem [resolvable:$true] %s230_s5 }
  0x56   : > { %s1025_s6 = scalar_lea.hbm %s1478_s2, 256  ;;  %p1026_p5 = scmp.lt.u32.totalorder %s1318_s19, %s1478_s2 }
  0x57   : > { %p1023_p2 = pnand %p1021_p11, %p1270_p4  ;;  %p1027_p7 = scmp.lt.u32.totalorder %s1025_s6, %s1020_s22 }
  0x58   : > { %p1029_p8 = scmp.lt.u32.totalorder %s1020_s22, %s1318_s19 }
  0x59   : > { %p1024_p3 = pneg %p1023_p2  ;;  %p1028_p10 = por %p1027_p7, %p1026_p5 }
  0x5b   : > { %p1030_p9 = por %p1029_p8, %p1028_p10 }
  0x5d   : > { %p1031_p12 = pnand %p1030_p9, %p1024_p3 }
  0x5f   : > { %1034 = shalt.err (!%p1031_p12)
}
  0x60   : > { %s1035_s1 = scalar_lea.vmem %s1350_s5, 128  ;;  %s1142_s28 = smov [#allocation11]  }
  0x61   : > { %p1036_p1 = scmp.ne.s32.totalorder %s1350_s5, %s1035_s1  ;;  %s1040_s29 = sshll.u32 %s1142_s28, 4  ;;  %s1041_s29 = int_to_ptr.vmem [resolvable:$false] %s1040_s29 }
  0x62   : > { %s1042_s23 = scalar_lea.vmem %s1041_s29, 256  ;;  %p1043_p11 = scmp.lt.s32.totalorder %s1350_s5, %s1041_s29 }
  0x63   : > { %p1038_p6 = pnand %p1036_p1, %p1270_p4  ;;  %p1044_p2 = scmp.lt.s32.totalorder %s1042_s23, %s1035_s1 }
  0x65   : > { %p1039_p13 = pneg %p1038_p6  ;;  %p1045_p5 = por %p1044_p2, %p1043_p11 }
  0x67   : > { %p1046_p7 = pnand %p1045_p5, %p1039_p13 }
  0x69   : > { %1049 = shalt.err (!%p1046_p7)
}
  0x6a   : > { %881 = dma.hbm_to_vmem [thread:$0]  (!%p1248_p0), %s1318_s19, 128, %s1350_s5, %s1264_s11, %s1505_s20, %s1505_s20, %s1504_s16  }
  0x6b   : > { %p1506_p4 = scmp.ne.s32.totalorder %s1502_s9, 0 }
  0x6c   : > { %s1380_s21 = sand.u32 (!%p1506_p4), 1, %s1120_s13   ;;  %p1507_p3 = scmp.ne.s32.totalorder (!%p1506_p4), %s1493_s24, 0 }
  0x6d   : > { %242 = sbr.rel (%p1506_p4) target bundleno = 948 (0x3b4), region = 32  ;;  %s1383_s10 = sshll.u32 (!%p1506_p4), %s1380_s21, 3 }
  0x6e   : > { %s245_s4 = scalar_lea.sflag (!%p1506_p4), [#allocation7], %s1380_s21  ;;  %s248_s22 = scalar_lea.vmem (!%p1506_p4), [#allocation6], %s1383_s10 }
  0x74   : > { %1103 = dma.done.wait (%p1507_p3), %s245_s4, 128  }
  0x75   : > { %1105 = vsyncadd (%p1507_p3), %s245_s4, 4294967168  ;;  %s253_s11 = sand.u32 1, %s1201_s18   ;;  %s257_s9 = scalar_lea.vmem [#allocation9], %s1383_s10 }
  0x76   : > { %s254_s19 = scalar_lea.sflag [#allocation10], %s253_s11 }
  0x77   : > { %1107 = dma.done.wait (%p1507_p3), %s254_s19, 256  }
  0x78   : > { %1109 = vsyncadd (%p1507_p3), %s254_s19, 4294967040  ;;  %vm319_vm0 = vcmask 261120   ;;  %v1143_v0 = vmov 0.0   ;;  %vm1144_vm1 = vmmov 0   ;;  %v946_v1 = vld [vmem:[%s257_s9] sm:$0xff]   ;;  %vm321_vm2 = vcmask 7168  }
  0x79   : > { %852 = vmatprep.subr.bf16.mxu0 %v1143_v0  ;;  %326 = vst.msk [vmem:[#allocation5] sm:$0xff] %vm319_vm0, %v1143_v0  ;;  %327 = vst.msk [vmem:[#allocation5 + $0x8] sm:$0xff] %vm319_vm0, %v1143_v0  ;;  %854 = vmatprep.mubr.msk.bf16.mxu0 %vm1144_vm1, %v1143_v0  ;;  %v309_v2 = vld [vmem:[%s248_s22] sm:$0xf]  ;;  %v310_v3 = vld [vmem:[%s248_s22 + $0x4] sm:$0xf]  ;;  %v389_v10 = vlaneseq }
  0x7a   : > { %858 = vmatprep.subr.bf16.mxu1 %v1143_v0  ;;  %860 = vmatprep.mubr.msk.bf16.mxu1 %vm1144_vm1, %v1143_v0  ;;  %v343_v4 = vsel %vm319_vm0, %v946_v1, 0  ;;  %v311_v5 = vmul.bf16 1043676725, %v309_v2  ;;  %v312_v6 = vmul.bf16 1043676725, %v310_v3  ;;  %v1145_v9 = vmov -inf  }
  0x7b   : > { %853 = vmatpush3.bf16.xpose.msra.mxu0 %v343_v4  ;;  %322 = vst.msk [vmem:[#allocation3] sm:$0xff] %vm321_vm2, %v1145_v9  ;;  %323 = vst.msk [vmem:[#allocation3 + $0x8] sm:$0xff] %vm321_vm2, %v1145_v9  ;;  %v390_v11 = vand.u32 127, %v389_v10  ;;  %vm396_vm4 = vcmask 130048   ;;  %v1146_v20 = vmov 0   ;;  %s266_s18 = scalar_lea.vmem [#allocation11], %s1383_s10 }
  0x7c   : > { %v832_v7 = vcombine.low %v311_v5, %v312_v6  ;;  %324 = vst.msk [vmem:[#allocation4] sm:$0xff] %vm321_vm2, %v1143_v0  ;;  %325 = vst.msk [vmem:[#allocation4 + $0x8] sm:$0xff] %vm321_vm2, %v1143_v0  ;;  %944 = vset.pattern.permute.xlu1 %v1146_v20  ;;  %945 = vset.pattern.permute.xlu0 %v1146_v20  ;;  %v947_v29 = vld [vmem:[%s266_s18] sm:$0xff]   ;;  %s831_s24 = sshll.u32 %s1380_s21, 4  ;;  %s847_s16 = sshll.u32 %s1128_s15, 8 }
  0x7d   : > { %vm391_vm3 = vcmp.lt.s32.totalorder %v390_v11, 8  ;;  %859 = vmatpush3.bf16.msra.mxu1 %v947_v29  ;;  %s298_s20 = scalar_lea.vmem [#allocation12], %s831_s24  ;;  %s1424_s6 = scalar_lea.hbm %s1479_s3, %s847_s16 }
  0x7e   : > { %320 = vst.msk [vmem:[#allocation2] sm:$0xff] %vm319_vm0, %v832_v7  ;;  %s675_s5 = sshll.u32 %s298_s20, 4  ;;  %s660_s15 = scalar_lea.sflag [#allocation8], %s1380_s21  ;;  %s1426_s5 = int_to_ptr.vmem [resolvable:$true] %s675_s5 }
  0x7f   : > { %s1050_s8 = scalar_lea.vmem %s1426_s5, 256  ;;  %p1508_p10 = scmp.ne.s32.totalorder %s1494_s25, 0 }
  0x80   : > { %v442_v55 = vld [vmem:[#allocation5] sm:$0xff]  ;;  %v443_v57 = vld [vmem:[#allocation5 + $0x8] sm:$0xff]  ;;  %p1051_p0 = scmp.ne.s32.totalorder %s1426_s5, %s1050_s8  ;;  %s1147_s26 = smov [#allocation12]  }
  0x81   : > { %s1054_s1 = sshll.u32 %s1147_s26, 4  ;;  %s1055_s1 = int_to_ptr.vmem [resolvable:$false] %s1054_s1 }
  0x82   : > { %v394_v21 = vld [vmem:[#allocation3] sm:$0xff]  ;;  %v395_v24 = vld [vmem:[#allocation3 + $0x8] sm:$0xff]  ;;  %p1052_p8 = pnand %p1051_p0, %p1508_p10  ;;  %s1056_s28 = scalar_lea.vmem %s1055_s1, 512 }
  0x83   : > { %v427_v45 = vld [vmem:[#allocation4] sm:$0xff]  ;;  %v428_v48 = vld [vmem:[#allocation4 + $0x8] sm:$0xff]  ;;  %p1057_p12 = scmp.lt.s32.totalorder %s1426_s5, %s1055_s1  ;;  %p1058_p1 = scmp.lt.s32.totalorder %s1056_s28, %s1050_s8 }
  0x84   : > { %p1053_p9 = pneg %p1052_p8 }
  0x85   : > { %v328_v8 = vld [vmem:[#allocation2] sm:$0xff]  ;;  %p1059_p6 = por %p1058_p1, %p1057_p12 }
  0x86   : > { %855 = vmatmul.mubr.msk.bf16.vlgmr.msra.gmra.mrb[0].mxu0 %vm319_vm0, %v328_v8 }
  0x87   : > { %p1060_p13 = pnand %p1059_p6, %p1053_p9 }
 0x159   : > { %v379_v12 = vpop.f32.mrb[0].mxu0 }
 0x15a   : > { %v392_v13 = vsel %vm391_vm3, %v379_v12, -1e+30  ;;  %v856_v14 = vpop.f32.mrb[1].mxu0 }
 0x15b   : > { %v382_v15 = vpop.f32.mrb[2].mxu0  ;;  %v397_v16 = vsel %vm396_vm4, %v392_v13, -inf }
 0x15c   : > { %v393_v17 = vsel %vm391_vm3, %v382_v15, -1e+30  ;;  %398 = vmax.xlane.f32.xlu0 %v397_v16  ;;  %v857_v18 = vpop.f32.mrb[3].mxu0 }
 0x15d   : > { %v400_v19 = vsel %vm396_vm4, %v393_v17, -inf }
 0x160   : > { %401 = vmax.xlane.f32.xlu0 %v400_v19 }
 0x1e9   : > { %v399_v22 = vpop.xlane.xlu0 %398 }
 0x1ea   : > { %v403_v23 = vmax.f32 %v394_v21, %v399_v22 }
 0x1ec   : > { %v405_v25 = vsub.f32 %v394_v21, %v403_v23  ;;  %511 = vst.msk [vmem:[#allocation3] sm:$0xff] %vm321_vm2, %v403_v23  ;;  %413 = vperm.xlu1 %944, %v403_v23  }
 0x1ed   : > { %v402_v26 = vpop.xlane.xlu0 %401 }
 0x1ee   : > { %v404_v27 = vmax.f32 %v395_v24, %v402_v26  ;;  %v407_v42 = vmul.f32 1.442695, %v405_v25 }
 0x1f0   : > { %v406_v28 = vsub.f32 %v395_v24, %v404_v27  ;;  %512 = vst.msk [vmem:[#allocation3 + $0x8] sm:$0xff] %vm321_vm2, %v404_v27  ;;  %418 = vperm.xlu1 %944, %v404_v27  }
 0x1f2   : > { %v409_v41 = vmul.f32 1.442695, %v406_v28 }
 0x26b   : > { %v414_v30 = vpop.permute.xlu1 %413 }
 0x26c   : > { %v421_v31 = vsub.f32 %v392_v13, %v414_v30 }
 0x26e   : > { %v423_v32 = vmul.f32 1.442695, %v421_v31 }
 0x26f   : > { %v419_v33 = vpop.permute.xlu1 %418 }
 0x270   : > { %948 = vpow2.f32 %v423_v32  ;;  %v422_v34 = vsub.f32 %v393_v17, %v419_v33 }
 0x272   : > { %v425_v35 = vmul.f32 1.442695, %v422_v34 }
 0x274   : > { %950 = vpow2.f32 %v425_v35 }
 0x275   : > { %952 = vpow2.f32 %v409_v41 }
 0x276   : > { %954 = vpow2.f32 %v407_v42 }
 0x27a   : > { %v949_v36 = vpop.eup %948 }
 0x27b   : > { %v431_v37 = vsel %vm396_vm4, %v949_v36, 0.0 }
 0x27c   : > { %432 = vadd.xlane.f32.xlu0 %v431_v37 }
 0x27e   : > { %v951_v38 = vpop.eup %950 }
 0x27f   : > { %v434_v39 = vsel %vm396_vm4, %v951_v38, 0.0  ;;  %v456_v40 = vpack.c.bf16 %v951_v38, %v949_v36  ;;  %v953_v43 = vpop.eup %952 }
 0x280   : > { %435 = vadd.xlane.f32.xlu1 %v434_v39  ;;  %v955_v44 = vpop.eup %954  ;;  %v430_v50 = vmul.f32 %v953_v43, %v428_v48 }
 0x281   : > { %861 = vmatmul.mubr.msk.bf16.vlgmr.msra.gmra.mrb[0].mxu1 %vm396_vm4, %v456_v40  ;;  %v429_v46 = vmul.f32 %v955_v44, %v427_v45 }
 0x291   : > { %451 = vperm.xlu1 %944, %v953_v43  }
 0x292   : > { %446 = vperm.xlu0 %945, %v955_v44  }
 0x309   : > { %v433_v47 = vpop.xlane.xlu0 %432 }
 0x30a   : > { %v437_v49 = vadd.f32 %v433_v47, %v429_v46 }
 0x30c   : > { %440 = vst.msk [vmem:[#allocation4] sm:$0xff] %vm321_vm2, %v437_v49 }
 0x30d   : > { %v436_v51 = vpop.xlane.xlu1 %435 }
 0x30e   : > { %v438_v52 = vadd.f32 %v436_v51, %v430_v50 }
 0x310   : > { %441 = vst.msk [vmem:[#allocation4 + $0x8] sm:$0xff] %vm321_vm2, %v438_v52 }
 0x311   : > { %v447_v56 = vpop.permute.xlu0 %446  ;;  %v452_v58 = vpop.permute.xlu1 %451 }
 0x312   : > { %v454_v59 = vmul.f32 %v447_v56, %v442_v55  ;;  %v455_v61 = vmul.f32 %v452_v58, %v443_v57 }
 0x313   : > { %v641_v53 = vld [vmem:[#allocation4] sm:$0xff] }
 0x314   : > { %645 = vperm.xlu0 %945, %v641_v53  }
 0x317   : > { %v642_v54 = vld [vmem:[#allocation4 + $0x8] sm:$0xff] }
 0x318   : > { %650 = vperm.xlu0 %945, %v642_v54  }
 0x354   : > { %v500_v60 = vpop.f32.mrb[0].mxu1 }
 0x355   : > { %v507_v62 = vadd.f32 %v500_v60, %v454_v59  ;;  %v862_v63 = vpop.f32.mrb[1].mxu1 }
 0x356   : > { %v503_v0 = vpop.f32.mrb[2].mxu1 }
 0x357   : > { %509 = vst.msk [vmem:[#allocation5] sm:$0xff] %vm319_vm0, %v507_v62  ;;  %v508_v1 = vadd.f32 %v503_v0, %v455_v61  ;;  %v863_v2 = vpop.f32.mrb[3].mxu1 }
 0x359   : > { %510 = vst.msk [vmem:[#allocation5 + $0x8] sm:$0xff] %vm319_vm0, %v508_v1 }
 0x35e   : > { %v639_v6 = vld [vmem:[#allocation5] sm:$0xff] }
 0x360   : > { %v640_v9 = vld [vmem:[#allocation5 + $0x8] sm:$0xff] }
 0x393   : > { %v646_v3 = vpop.permute.xlu0 %645 }
 0x394   : > { %956 = vrcp.f32 %v646_v3 }
 0x397   : > { %v651_v4 = vpop.permute.xlu0 %650 }
 0x398   : > { %958 = vrcp.f32 %v651_v4 }
 0x39e   : > { %v957_v5 = vpop.eup %956 }
 0x39f   : > { %v654_v7 = vmul.f32 %v957_v5, %v639_v6 }
 0x3a1   : > { %657 = vst.msk [vmem:[%s298_s20] sm:$0xff] %vm319_vm0, %v654_v7 }
 0x3a2   : > { %v959_v8 = vpop.eup %958 }
 0x3a3   : > { %v656_v10 = vmul.f32 %v959_v8, %v640_v9 }
 0x3a5   : > { %658 = vst.msk [vmem:[%s298_s20 + $0x8] sm:$0xff] %vm319_vm0, %v656_v10 }
 0x3a6   : > { %1063 = shalt.err (!%p1060_p13)
}
 0x3a7   : > { %s1064_s29 = scalar_lea.hbm %s1424_s6, 256  ;;  %s1068_s4 = scalar_lea.hbm %s1479_s3, 512 }
 0x3a8   : > { %p1065_p11 = scmp.ne.s32.totalorder %s1424_s6, %s1064_s29  ;;  %p1069_p7 = scmp.lt.u32.totalorder %s1424_s6, %s1479_s3 }
 0x3a9   : > { %p1070_p4 = scmp.lt.u32.totalorder %s1068_s4, %s1064_s29  ;;  %p1072_p0 = scmp.lt.u32.totalorder %s1064_s29, %s1424_s6 }
 0x3aa   : > { %p1066_p2 = pnand %p1065_p11, %p1508_p10 }
 0x3ab   : > { %p1071_p3 = por %p1070_p4, %p1069_p7 }
 0x3ac   : > { %p1067_p5 = pneg %p1066_p2 }
 0x3ad   : > { %p1073_p8 = por %p1072_p0, %p1071_p3 }
 0x3af   : > { %p1074_p9 = pnand %p1073_p8, %p1067_p5 }
 0x3b1   : > { %1077 = shalt.err (!%p1074_p9)
}
 0x3b2   : > { %s1148_s19 = smov 128   ;;  %s1149_s9 = smov 8  }
 0x3b3   : > { %870 = dma.vmem_to_hbm [thread:$0]  (%p1508_p10), %s1426_s5, 256, %s1424_s6, %s660_s15, %s1148_s19, %s1148_s19, %s1149_s9  }
 0x3b4 PF: > { %s690_s18 = sand.u32 1, %s1116_s12   ;;  %p1509_p12 = scmp.ne.s32.totalorder %s1496_s27, 0 }
 0x3b5   : > { %p1510_p1 = scmp.ge.s32.totalorder %s1136_s17, 2  ;;  %s691_s24 = scalar_lea.sflag [#allocation8], %s690_s18 }
 0x3b7   : > { %p883_p6 = pnand %p1510_p1, %p1509_p12 }
 0x3b9   : > { %1111 = dma.done.wait (!%p883_p6), %s691_s24, 256  }
 0x3ba   : > { %1113 = vsyncadd (!%p883_p6), %s691_s24, 4294967040  ;;  %s22_s17 = sadd.s32 1, %s1136_s17   ;;  %s1511_s16 = sld [smem:[#allocation18_spill]] }
 0x3bb   : > { %p19_p13 = scmp.ge.s32.totalorder %s22_s17, 4   ;;  %s1512_s15 = sld [smem:[#allocation16_spill]] }
 0x3bc   : > { %s1513_s25 = sld [smem:[#allocation17_spill]]  ;;  %s1514_s12 = smov %s1120_s13 }
 0x3bd   : > { %s1515_s13 = smov %s1124_s14  ;;  %21 = sbr.rel (!%p19_p13) target bundleno = 10 (0xa), region = 117 }
 0x3c0   : > { %s1516_s14 = smov %s1511_s16 }
 0x3c2   : > { %s1517_s16 = smov %s1513_s25 }
 0x3c4   :  { %696 = vsyncpa [#allocation7], 1 }
 0x3c5   :  { %698 = vsyncpa [#allocation7 + $0x1], 1 }
 0x3c6   :  { %699 = vsyncpa [#allocation10], 1 }
 0x3c7   :  { %701 = vsyncpa [#allocation10 + $0x1], 1 }
 0x3c8   :  { %702 = vsyncpa [#allocation8], 1 }
 0x3c9   :  { %704 = vsyncpa [#allocation8 + $0x1], 1 }

</bundles_post_ra>
